<compile_context>
chip_gen: v5e
topology: v5e:2x2
jax: 0.10.0
libtpu: 0.0.40
codegen_flags: <defaults>
</compile_context>

<pallas_src>
import functools

import jax
import jax.numpy as jnp
from jax.experimental import pallas as pl
from jax.experimental.pallas import tpu as pltpu


def _round_up(x, m):
    return (x + m - 1) // m * m


def _vmem_capacity_bytes():
    """Per-core VMEM capacity; conservative fallback if the query fails."""
    try:
        info = pltpu.get_tpu_info()
        cap = getattr(info, "vmem_capacity_bytes", None)
        if cap:
            return int(cap)
    except Exception:
        pass
    return 64 * 2**20  # v7x per-TensorCore (most restrictive generation)


def _pick_tile_l(lout, c_rows, cout_pg, nq, halo, mxu_item, out_item,
                 budget_bytes):
    """Largest lane-aligned output tile whose full pipelined working set fits."""
    cap = _round_up(max(lout, 1), halo)
    chosen = halo
    for cand in (4096, 2048, 1024, 512, 256, 128):
        if cand % halo or cand > cap:
            continue
        # double-buffered pipeline blocks
        dbuf = 2 * c_rows * (cand + halo) * mxu_item          # x main + halo
        dbuf += 2 * cout_pg * cand * out_item                  # output tile
        dbuf += 2 * cout_pg * (nq * c_rows) * mxu_item         # weight block
        dbuf += 2 * cout_pg * 4                                 # bias (f32)
        # persistent scratch + in-kernel temporaries
        scratch = nq * c_rows * cand * mxu_item                 # im2col scratch
        scratch += 2 * cout_pg * cand * 4                       # f32 acc / epilogue
        if dbuf + scratch <= budget_bytes:
            chosen = cand
            break
    return min(max(chosen, halo), cap)


def _disc_block_kernel(x_ref, xh_ref, w_ref, b_ref, o_ref, xcol_ref, *,
                       nq, tile_l, negative_slope):
    # x_ref   : (1, 1, C, TILE_L)     main input tile, C = stride*Cin_pg (phase-merged)
    # xh_ref  : (1, 1, C, HALO)       lane-aligned halo just past the main tile
    # w_ref   : (1, Cout_pg, nq*C)    q-major im2col weight for this group
    # b_ref   : (1, Cout_pg, 1)       bias (f32)
    # o_ref   : (1, 1, Cout_pg, TILE_L)
    # xcol_ref: VMEM (nq*C, TILE_L)   im2col scratch (MXU operand dtype)
    c_rows = x_ref.shape[2]
    xm = x_ref[0, 0]                      # (C, TILE_L)
    xh = xh_ref[0, 0]                     # (C, HALO)

    # Build im2col directly in scratch: no full-tile concatenate, at most two
    # slice-stores per tap (tile_l - q columns from the main tile, q from the halo).
    xcol_ref[0:c_rows, :] = xm
    for q in range(1, nq):
        r0 = q * c_rows
        xcol_ref[r0:r0 + c_rows, :tile_l - q] = xm[:, q:]
        xcol_ref[r0:r0 + c_rows, tile_l - q:] = xh[:, :q]

    # Single MXU contraction per grid step; accumulate in f32 on the MXU path.
    acc = jnp.dot(w_ref[0], xcol_ref[...], preferred_element_type=jnp.float32)
    acc = acc + b_ref[0]
    y = jnp.where(acc >= 0, acc, negative_slope * acc)   # LeakyReLU(0.1)
    o_ref[0, 0] = y.astype(o_ref.dtype)


def discriminator_block(x, weight, bias, *, stride, padding, groups=1,
                        weight_g=None, negative_slope=0.1, mxu_dtype=None):
    """Forward of DiscriminatorBlock: LeakyReLU(0.1)(weight_norm Conv1d(x)).

    `weight` is the weight_norm direction tensor `v`; if `weight_g` is given the
    effective weight g * v / ||v|| (per output channel, PyTorch dim=0) is used,
    otherwise `weight` is taken as the already-effective conv weight.
    """
    B, Cin, L = x.shape
    Cout, Cin_pg, K = weight.shape
    assert Cin == Cin_pg * groups and Cout % groups == 0
    Cout_pg = Cout // groups
    Lout = (L + 2 * padding - K) // stride + 1
    assert Lout > 0

    out_dtype = x.dtype
    if mxu_dtype is None:
        # v6e/v7x MXU is bf16-native; f32 matmul is multi-pass emulation.
        mxu_dtype = jnp.bfloat16 if x.dtype == jnp.float32 else x.dtype
    mxu_dtype = jnp.dtype(mxu_dtype)

    # Fold weight_norm (PyTorch default dim=0): w = g * v / ||v||_(in,k).
    w32 = weight.astype(jnp.float32)
    if weight_g is not None:
        norm = jnp.sqrt(jnp.sum(w32 * w32, axis=(1, 2), keepdims=True))
        w32 = weight_g.reshape(-1, 1, 1).astype(jnp.float32) * w32 / norm

    # Tap decomposition: k = q*stride + p, q in [0, nq), p in [0, stride).
    qmax = (K - 1) // stride
    nq = qmax + 1
    halo = _round_up(max(qmax, 1), 128)       # lane-aligned halo block width
    C = stride * Cin_pg                        # merged (phase, channel) rows

    # Generation-aware VMEM budget (v5e/v6e: 128 MiB, v7x: 64 MiB per core).
    mxu_item = jnp.dtype(mxu_dtype).itemsize
    out_item = jnp.dtype(out_dtype).itemsize
    vmem_cap = _vmem_capacity_bytes()
    vmem_limit = max(min(int(vmem_cap * 0.7), 100 * 2**20), 32 * 2**20)
    budget = vmem_limit - 4 * 2**20
    assert budget > 0

    tile_l = _pick_tile_l(Lout, C, Cout_pg, nq, halo, mxu_item, out_item, budget)
    assert tile_l % 128 == 0 and tile_l % halo == 0 and halo % 128 == 0
    assert qmax < tile_l and qmax <= halo
    n_tiles = pl.cdiv(Lout, tile_l)
    lout_pad = n_tiles * tile_l
    lphase = lout_pad + halo                   # per-phase padded length
    lpad_total = stride * lphase               # padded signal length

    right_pad = lpad_total - L - padding
    assert right_pad >= 0, (right_pad, L, padding, lpad_total)
    x_pad = jnp.pad(x, ((0, 0), (0, 0), (padding, right_pad)))

    # Phase de-interleave, merging the phase into the channel/sublane dim:
    # x_d[b, g, p*Cin_pg + c, j] = x_pad[b, g*Cin_pg + c, j*stride + p]
    x_d = (x_pad.reshape(B, groups, Cin_pg, lphase, stride)
                .transpose(0, 1, 4, 2, 3)
                .reshape(B, groups, C, lphase)
                .astype(mxu_dtype))

    # im2col weight, q-major rows (q, phase, channel); zero-pad taps to nq*stride.
    w_padk = jnp.pad(w32, ((0, 0), (0, 0), (0, nq * stride - K)))
    w_r = (w_padk.reshape(groups, Cout_pg, Cin_pg, nq, stride)
                 .transpose(0, 1, 3, 4, 2)
                 .reshape(groups, Cout_pg, nq * C)
                 .astype(mxu_dtype))
    b_r = bias.astype(jnp.float32).reshape(groups, Cout_pg, 1)

    kernel = functools.partial(_disc_block_kernel, nq=nq, tile_l=tile_l,
                               negative_slope=negative_slope)
    hb = tile_l // halo                        # halo blocks per output tile

    out = pl.pallas_call(
        kernel,
        out_shape=jax.ShapeDtypeStruct((B, groups, Cout_pg, lout_pad), out_dtype),
        grid_spec=pltpu.PrefetchScalarGridSpec(
            num_scalar_prefetch=0,
            # groups outermost -> weight/bias DMA'd once per group, resident over
            # all (batch, L-tile) steps.
            grid=(groups, B, n_tiles),
            in_specs=[
                # main x tile for this (group, batch, L-tile)
                pl.BlockSpec((1, 1, C, tile_l), lambda g, b, i: (b, g, 0, i)),
                # lane-aligned halo block just past the main tile
                pl.BlockSpec((1, 1, C, halo),
                             lambda g, b, i: (b, g, 0, (i + 1) * hb)),
                # per-group im2col weight / bias (constant over b and i)
                pl.BlockSpec((1, Cout_pg, nq * C), lambda g, b, i: (g, 0, 0)),
                pl.BlockSpec((1, Cout_pg, 1), lambda g, b, i: (g, 0, 0)),
            ],
            out_specs=pl.BlockSpec((1, 1, Cout_pg, tile_l),
                                   lambda g, b, i: (b, g, 0, i)),
            scratch_shapes=[pltpu.VMEM((nq * C, tile_l), mxu_dtype)],
        ),
        compiler_params=pltpu.CompilerParams(
            dimension_semantics=("parallel", "parallel", "parallel"),
            vmem_limit_bytes=vmem_limit,
        ),
    )(x_d, x_d, w_r, b_r)

    return out[..., :Lout].reshape(B, Cout, Lout)


if __name__ == "__main__":
    key = jax.random.PRNGKey(0)
    # Small shapes consistent with the module (Conv1d over a 1-D signal).
    B, Cin, L = 2, 4, 48
    Cout, K, stride, padding, groups = 8, 5, 2, 2, 2

    k_x, k_v, k_g, k_b = jax.random.split(key, 4)
    x = jax.random.normal(k_x, (B, Cin, L), dtype=jnp.float32)
    v = 0.1 * jax.random.normal(k_v, (Cout, Cin // groups, K), dtype=jnp.float32)
    g = 0.5 + jax.random.uniform(k_g, (Cout,), dtype=jnp.float32)
    bias = 0.1 * jax.random.normal(k_b, (Cout,), dtype=jnp.float32)

    # Effective weight_norm weight (PyTorch dim=0): w = g * v / ||v||.
    w_eff = g.reshape(-1, 1, 1) * v / jnp.sqrt(
        jnp.sum(v * v, axis=(1, 2), keepdims=True))

    def ref_forward(x_in, w_in):
        y = jax.lax.conv_general_dilated(
            x_in, w_in, window_strides=(stride,), padding=[(padding, padding)],
            dimension_numbers=("NCH", "OIH", "NCH"), feature_group_count=groups)
        y = y + bias.reshape(1, Cout, 1)
        return jnp.where(y >= 0, y, 0.1 * y)

    # 1) exact-precision path (f32 MXU operands).
    out_f32 = discriminator_block(x, v, bias, weight_g=g, stride=stride,
                                  padding=padding, groups=groups,
                                  mxu_dtype=jnp.float32)
    out_f32 = jax.block_until_ready(out_f32)
    ref_f32 = ref_forward(x, w_eff)
    assert out_f32.shape == ref_f32.shape, (out_f32.shape, ref_f32.shape)
    assert jnp.allclose(out_f32, ref_f32, atol=1e-5, rtol=1e-5), \
        float(jnp.max(jnp.abs(out_f32 - ref_f32)))

    # 2) default fast path: bf16 MXU operands, f32 accumulation (v6e/v7x MXU).
    out_bf = discriminator_block(x, v, bias, weight_g=g, stride=stride,
                                 padding=padding, groups=groups)
    out_bf = jax.block_until_ready(out_bf)
    ref_bf = ref_forward(x.astype(jnp.bfloat16).astype(jnp.float32),
                         w_eff.astype(jnp.bfloat16).astype(jnp.float32))
    assert jnp.allclose(out_bf, ref_bf, atol=2e-2, rtol=2e-2), \
        float(jnp.max(jnp.abs(out_bf - ref_bf)))

    print("KERNEL_OK")
</pallas_src>

<mosaic_0001>
module attributes {stable_mosaic.version = 11 : i64} {
  func.func @_disc_block_kernel(%arg0: i32, %arg1: i32, %arg2: i32, %arg3: memref<1x1x4x128xf32, #tpu.memory_space<vmem>>, %arg4: memref<1x1x4x128xf32, #tpu.memory_space<vmem>>, %arg5: memref<1x4x12xf32, #tpu.memory_space<vmem>>, %arg6: memref<1x4x1xf32, #tpu.memory_space<vmem>>, %arg7: memref<1x1x4x128xf32, #tpu.memory_space<vmem>>, %arg8: memref<12x128xf32, #tpu.memory_space<vmem>>) attributes {dimension_semantics = [#tpu.dimension_semantics<parallel>, #tpu.dimension_semantics<parallel>, #tpu.dimension_semantics<parallel>], iteration_bounds = array<i64: 2, 2, 1>, scalar_prefetch = 0 : i64, scratch_operands = 1 : i64, tpu.core_type = #tpu.core_type<tc>, window_params = [{transform_indices = @transform_0, window_bounds = array<i64: 1, 1, 4, 128>}, {transform_indices = @transform_1, window_bounds = array<i64: 1, 1, 4, 128>}, {transform_indices = @transform_2, window_bounds = array<i64: 1, 4, 12>}, {transform_indices = @transform_3, window_bounds = array<i64: 1, 4, 1>}, {transform_indices = @transform_4, window_bounds = array<i64: 1, 1, 4, 128>}]} {
    %c0 = arith.constant 0 : index
    %c0_0 = arith.constant 0 : index
    %c0_1 = arith.constant 0 : index
    %c0_2 = arith.constant 0 : index
    %0 = vector.load %arg3[%c0, %c0_0, %c0_1, %c0_2] : memref<1x1x4x128xf32, #tpu.memory_space<vmem>>, vector<1x1x4x128xf32>
    %1 = vector.shape_cast %0 : vector<1x1x4x128xf32> to vector<4x128xf32>
    %c0_3 = arith.constant 0 : index
    %c0_4 = arith.constant 0 : index
    %c0_5 = arith.constant 0 : index
    %c0_6 = arith.constant 0 : index
    %2 = vector.load %arg4[%c0_3, %c0_4, %c0_5, %c0_6] : memref<1x1x4x128xf32, #tpu.memory_space<vmem>>, vector<1x1x4x128xf32>
    %3 = vector.shape_cast %2 : vector<1x1x4x128xf32> to vector<4x128xf32>
    %c0_7 = arith.constant 0 : index
    %c0_8 = arith.constant 0 : index
    %4 = vector.load %arg8[%c0_7, %c0_8] : memref<12x128xf32, #tpu.memory_space<vmem>>, vector<4x128xf32>
    tpu.vector_store %arg8[%c0_7, %c0_8], %1 {strides = array<i32>} : memref<12x128xf32, #tpu.memory_space<vmem>>, vector<4x128xf32>,
    %5 = vector.extract_strided_slice %1 {offsets = [0, 1], sizes = [4, 127], strides = [1, 1]} : vector<4x128xf32> to vector<4x127xf32>
    %c4 = arith.constant 4 : index
    %c0_9 = arith.constant 0 : index
    %6 = vector.load %arg8[%c4, %c0_9] : memref<12x128xf32, #tpu.memory_space<vmem>>, vector<4x127xf32>
    tpu.vector_store %arg8[%c4, %c0_9], %5 {strides = array<i32>} : memref<12x128xf32, #tpu.memory_space<vmem>>, vector<4x127xf32>,
    %7 = vector.extract_strided_slice %3 {offsets = [0, 0], sizes = [4, 1], strides = [1, 1]} : vector<4x128xf32> to vector<4x1xf32>
    %c4_10 = arith.constant 4 : index
    %c127 = arith.constant 127 : index
    %8 = vector.load %arg8[%c4_10, %c127] : memref<12x128xf32, #tpu.memory_space<vmem>>, vector<4x1xf32>
    tpu.vector_store %arg8[%c4_10, %c127], %7 {strides = array<i32>} : memref<12x128xf32, #tpu.memory_space<vmem>>, vector<4x1xf32>,
    %9 = vector.extract_strided_slice %1 {offsets = [0, 2], sizes = [4, 126], strides = [1, 1]} : vector<4x128xf32> to vector<4x126xf32>
    %c8 = arith.constant 8 : index
    %c0_11 = arith.constant 0 : index
    %10 = vector.load %arg8[%c8, %c0_11] : memref<12x128xf32, #tpu.memory_space<vmem>>, vector<4x126xf32>
    tpu.vector_store %arg8[%c8, %c0_11], %9 {strides = array<i32>} : memref<12x128xf32, #tpu.memory_space<vmem>>, vector<4x126xf32>,
    %11 = vector.extract_strided_slice %3 {offsets = [0, 0], sizes = [4, 2], strides = [1, 1]} : vector<4x128xf32> to vector<4x2xf32>
    %c8_12 = arith.constant 8 : index
    %c126 = arith.constant 126 : index
    %12 = vector.load %arg8[%c8_12, %c126] : memref<12x128xf32, #tpu.memory_space<vmem>>, vector<4x2xf32>
    tpu.vector_store %arg8[%c8_12, %c126], %11 {strides = array<i32>} : memref<12x128xf32, #tpu.memory_space<vmem>>, vector<4x2xf32>,
    %c0_13 = arith.constant 0 : index
    %c0_14 = arith.constant 0 : index
    %c0_15 = arith.constant 0 : index
    %13 = vector.load %arg5[%c0_13, %c0_14, %c0_15] : memref<1x4x12xf32, #tpu.memory_space<vmem>>, vector<1x4x12xf32>
    %14 = vector.shape_cast %13 : vector<1x4x12xf32> to vector<4x12xf32>
    %c0_16 = arith.constant 0 : index
    %c0_17 = arith.constant 0 : index
    %15 = vector.load %arg8[%c0_16, %c0_17] : memref<12x128xf32, #tpu.memory_space<vmem>>, vector<12x128xf32>
    %cst = arith.constant dense<0.000000e+00> : vector<4x128xf32>
    %16 = tpu.matmul %14, %15, %cst {dimension_numbers = #tpu.dot_dimension_numbers<[1], [0], [0], [1], [0, 0, 1, 1], [], []>} : vector<4x12xf32>, vector<12x128xf32>, vector<4x128xf32> -> vector<4x128xf32>
    %c0_18 = arith.constant 0 : index
    %c0_19 = arith.constant 0 : index
    %c0_20 = arith.constant 0 : index
    %17 = vector.load %arg6[%c0_18, %c0_19, %c0_20] : memref<1x4x1xf32, #tpu.memory_space<vmem>>, vector<1x4x1xf32>
    %18 = vector.shape_cast %17 : vector<1x4x1xf32> to vector<4x1xf32>
    %19 = vector.broadcast %18 : vector<4x1xf32> to vector<4x128xf32>
    %20 = arith.addf %16, %19 : vector<4x128xf32>
    %cst_21 = arith.constant 0.000000e+00 : f32
    %21 = vector.broadcast %cst_21 : f32 to vector<4x128xf32>
    %22 = arith.cmpf oge, %20, %21 : vector<4x128xf32>
    %cst_22 = arith.constant 1.000000e-01 : f32
    %23 = vector.broadcast %cst_22 : f32 to vector<4x128xf32>
    %24 = arith.mulf %23, %20 : vector<4x128xf32>
    %25 = arith.select %22, %20, %24 : vector<4x128xi1>, vector<4x128xf32>
    %c0_23 = arith.constant 0 : index
    %c0_24 = arith.constant 0 : index
    %c0_25 = arith.constant 0 : index
    %c0_26 = arith.constant 0 : index
    %26 = vector.load %arg7[%c0_23, %c0_24, %c0_25, %c0_26] : memref<1x1x4x128xf32, #tpu.memory_space<vmem>>, vector<1x1x4x128xf32>
    %27 = vector.shape_cast %26 : vector<1x1x4x128xf32> to vector<4x128xf32>
    %28 = vector.shape_cast %25 : vector<4x128xf32> to vector<1x1x4x128xf32>
    tpu.vector_store %arg7[%c0_23, %c0_24, %c0_25, %c0_26], %28 {strides = array<i32>} : memref<1x1x4x128xf32, #tpu.memory_space<vmem>>, vector<1x1x4x128xf32>,
    return
  }
  func.func @transform_0(%arg0: i32, %arg1: i32, %arg2: i32) -> (i32, i32, i32, i32) {
    %c0_i32 = arith.constant 0 : i32
    %c0_i32_0 = arith.constant 0 : i32
    return %arg1, %arg0, %c0_i32, %arg2 : i32, i32, i32, i32
  }
  func.func @transform_1(%arg0: i32, %arg1: i32, %arg2: i32) -> (i32, i32, i32, i32) {
    %c1_i32 = arith.constant 1 : i32
    %0 = arith.addi %arg2, %c1_i32 : i32
    %c1_i32_0 = arith.constant 1 : i32
    %1 = arith.muli %0, %c1_i32_0 : i32
    %c0_i32 = arith.constant 0 : i32
    %c0_i32_1 = arith.constant 0 : i32
    return %arg1, %arg0, %c0_i32, %1 : i32, i32, i32, i32
  }
  func.func @transform_2(%arg0: i32, %arg1: i32, %arg2: i32) -> (i32, i32, i32) {
    %c0_i32 = arith.constant 0 : i32
    %c0_i32_0 = arith.constant 0 : i32
    %c0_i32_1 = arith.constant 0 : i32
    return %arg0, %c0_i32, %c0_i32_0 : i32, i32, i32
  }
  func.func @transform_3(%arg0: i32, %arg1: i32, %arg2: i32) -> (i32, i32, i32) {
    %c0_i32 = arith.constant 0 : i32
    %c0_i32_0 = arith.constant 0 : i32
    %c0_i32_1 = arith.constant 0 : i32
    return %arg0, %c0_i32, %c0_i32_0 : i32, i32, i32
  }
  func.func @transform_4(%arg0: i32, %arg1: i32, %arg2: i32) -> (i32, i32, i32, i32) {
    %c0_i32 = arith.constant 0 : i32
    %c0_i32_0 = arith.constant 0 : i32
    return %arg1, %arg0, %c0_i32, %arg2 : i32, i32, i32, i32
  }
}

</mosaic_0001>

<bundles_post_ra>
// kernel: tpu_custom_call.1
= control target key start
LH: loop header
LB: loop body
LE: loop exit
PB: predicated region body
PF: predicated region fallthrough
CT: control target
= control target key end

     0   :  { %9 = vsyncpa [#allocation4], 0  ;;  %s1040_s0 = inlined_call_operand.hbm [shape: f32[2,2,4,256], index: 0, kind: input, shape index: {}]   ;;  %s1041_s1 = inlined_call_operand.hbm [shape: f32[2,2,4,256], index: 1, kind: input, shape index: {}]   ;;  %s1042_s2 = inlined_call_operand.vmem [shape: f32[2,4,12], index: 2, kind: input, shape index: {}]   ;;  %s1043_s3 = inlined_call_operand.vmem [shape: f32[2,4,1], index: 3, kind: input, shape index: {}]   ;;  %s1044_s4 = inlined_call_operand.hbm [shape: f32[2,2,4,128], index: 4, kind: output, shape index: {}]  }
   0x1   :  { %11 = vsyncpa [#allocation4 + $0x1], 0 }
   0x2   :  { %12 = vsyncpa [#allocation7], 0 }
   0x3   :  { %14 = vsyncpa [#allocation7 + $0x1], 0 }
   0x4   :  { %15 = vsyncpa [#allocation5], 0 }
   0x5   :  { %17 = vsyncpa [#allocation5 + $0x1], 0  ;;  %s864_s15 = smov 0   ;;  %s866_s16 = smov 0  }
   0x6   :  { %s868_s17 = smov 0   ;;  %s870_s18 = smov 0  }
   0x7   :  { %s872_s19 = smov 0   ;;  %s874_s20 = smov 0  }
   0x8   :  { %s876_s21 = smov 0   ;;  %s878_s22 = smov 0  }
   0x9 LB: > { %1049 = sst [smem:[#allocation12_spill]] %s826_s20  ;;  %s559_s23 = sadd.s32 4294967295, %s834_s22   ;;  %s834_s22 = sphi %s878_s22, %s23_s22   ;;  %s830_s21 = sphi %s876_s21, %s1061_s21   ;;  %s826_s20 = sphi %s874_s20, %s1060_s20   ;;  %s822_s19 = sphi %s872_s19, %s1059_s19   ;;  %s818_s18 = sphi %s870_s18, %s1058_s18   ;;  %s814_s17 = sphi %s868_s17, %s1064_s17   ;;  %s810_s16 = sphi %s866_s16, %s1063_s16   ;;  %s806_s15 = sphi %s864_s15, %s1062_s15  }
   0xa   : > { %1050 = sst [smem:[#allocation13_spill]] %s830_s21  ;;  %s560_s24 = sadd.s32 4294967294, %s834_s22  }
   0xb   : > { %s38_s25 = sadd.s32 1, %s826_s20  ;;  %s42_s26 = sadd.s32 1, %s830_s21 }
   0xc   : > { %p40_p0 = scmp.ge.s32.totalorder %s38_s25, 2  ;;  %s53_s27 = sadd.s32 1, %s814_s17 }
   0xd   : > { %p60_p1 = scmp.ne.s32.totalorder %s814_s17, %s810_s16  ;;  %p61_p2 = scmp.eq.s32.totalorder %s834_s22, 0 }
   0xe   : > { %s1066_s25 = smov (%p40_p0, %s38_s25), 0  ;;  %s1068_s26 = smov (!%p40_p0, %s42_s26), %s830_s21 }
   0xf   : > { %1051 = sst [smem:[#allocation14_spill]] %s1066_s25  ;;  %s46_s28 = ssub.s32 %s826_s20, %s1066_s25 }
  0x10   : > { %p917_p3 = por %p61_p2, %p60_p1  ;;  %p44_p4 = scmp.ge.s32.totalorder %s1068_s26, 2 }
  0x11   : > { %p66_p5 = scmp.ne.s32.totalorder %s810_s16, %s806_s15  ;;  %p67_p6 = scmp.eq.s32.totalorder %s559_s23, 0 }
  0x12   : > { %p178_p7 = scmp.eq.s32.totalorder %s559_s23, 3  ;;  %s1070_s26 = smov (%p44_p4, %s1068_s26), 0 }
  0x13   : > { %1053 = sst [smem:[#allocation15_spill]] %s1070_s26  ;;  %p925_p8 = por %p67_p6, %p66_p5 }
  0x14   : > { %p929_p9 = por %p178_p7, %p60_p1  ;;  %s47_s6 = ssub.s32 %s830_s21, %s1070_s26 }
  0x15   : > { %p184_p10 = scmp.eq.s32.totalorder %s560_s24, 3  ;;  %s48_s7 = sor.u32 %s47_s6, %s46_s28 }
  0x16   : > { %p51_p11 = scmp.eq.s32.totalorder %s48_s7, 0  ;;  %p601_p13 = scmp.lt.s32.totalorder %s834_s22, 4 }
  0x17   : > { %p935_p12 = por %p184_p10, %p66_p5  ;;  %s941_s9 = sand.u32 1, %s814_s17  }
  0x18   : > { %s944_s10 = scalar_select %p51_p11, %s814_s17, %s53_s27  }
  0x19   : > { %s563_s11 = sshll.u32 %s941_s9, 2  ;;  %s564_s12 = sshll.u32 %s830_s21, 1 }
  0x1a   : > { %s565_s13 = sshll.u32 %s826_s20, 2  ;;  %s208_s14 = scalar_lea.vmem [#allocation3], %s563_s11 }
  0x1b   : > { %s220_s23 = sshll.u32 %s208_s14, 4  ;;  %s214_s24 = sadd.s32 %s565_s13, %s564_s12  ;;  %s221_s23 = int_to_ptr.vmem [resolvable:$true] %s220_s23 }
  0x1c   : > { %s566_s28 = sshll.u32 %s214_s24, 2  ;;  %p951_p0 = pnand %p601_p13, %p917_p3 }
  0x1d   : > { %s216_s27 = scalar_lea.hbm %s1040_s0, %s566_s28  ;;  %p571_p1 = scmp.ge.s32.totalorder %s834_s22, 1 }
  0x1e   : > { %s218_s25 = sshll.u32 %s216_s27, 4  ;;  %p263_p2 = scmp.lt.s32.totalorder %s834_s22, 5  ;;  %s219_s25 = int_to_ptr.hbm [resolvable:$true] %s218_s25 }
  0x1f   : > { %s205_s14 = scalar_lea.sflag [#allocation4], %s941_s9  ;;  %s460_s13 = scalar_lea.hbm %s1041_s1, %s566_s28 }
  0x20   : > { %593 = dma.hbm_to_vmem [thread:$0]  (!%p951_p0), %s219_s25, 64, %s221_s23, %s205_s14  }
  0x21   : > { %p264_p4 = pnand %p571_p1, %p263_p2  ;;  %s461_s24 = scalar_lea.hbm %s460_s13, 4 }
  0x22   : > { %s231_s21 = scalar_lea.vmem [#allocation6], %s563_s11  ;;  %s242_s26 = sshll.u32 %s461_s24, 4  ;;  %s243_s26 = int_to_ptr.hbm [resolvable:$true] %s242_s26 }
  0x23   : > { %s244_s20 = sshll.u32 %s231_s21, 4  ;;  %s228_s7 = scalar_lea.sflag [#allocation7], %s941_s9  ;;  %s245_s20 = int_to_ptr.vmem [resolvable:$true] %s244_s20 }
  0x24   : > { %596 = dma.hbm_to_vmem [thread:$0]  (!%p951_p0), %s243_s26, 64, %s245_s20, %s228_s7  }
  0x25   : > { %267 = sbr.rel (%p264_p4) target bundleno = 314 (0x13a), region = 36  ;;  %s970_s27 = sand.u32 (!%p264_p4), 1, %s810_s16  }
  0x26   : > { %s973_s25 = sshll.u32 (!%p264_p4), %s970_s27, 2  ;;  %s270_s23 = scalar_lea.sflag (!%p264_p4), [#allocation4], %s970_s27 }
  0x27   : > { %s273_s28 = scalar_lea.vmem (!%p264_p4), [#allocation3], %s973_s25 }
  0x2a   : > { %793 = dma.done.wait (%p925_p8), %s270_s23, 64  }
  0x2b   : > { %795 = vsyncadd (%p925_p8), %s270_s23, 4294967232  ;;  %s280_s20 = scalar_lea.sflag [#allocation7], %s970_s27  ;;  %s283_s21 = scalar_lea.vmem [#allocation6], %s973_s25 }
  0x2c   : > { %797 = dma.done.wait (%p925_p8), %s280_s20, 64  }
  0x2d   : > { %799 = vsyncadd (%p925_p8), %s280_s20, 4294967232  ;;  %v331_v0 = vld [vmem:[%s273_s28] sm:$0xf]  ;;  %s836_s9 = smov 126   ;;  %s837_s11 = smov 127   ;;  %v838_v3 = vmov 0  }
  0x2e   : > { %346 = vrot.lane.b32.xlu0 %v331_v0, %s836_s9  ;;  %333 = vst [vmem:[#allocation2] sm:$0xf] %v331_v0  ;;  %335 = vrot.lane.b32.xlu1 %v331_v0, %s837_s11  ;;  %v332_v1 = vld [vmem:[%s283_s21] sm:$0xf]  ;;  %p323_p3 = scmp.lt.s32.totalorder %s822_s19, 1  ;;  %vm349_vm0 = vcmask 1027072  }
  0x2f   : > { %670 = vset.pattern.permute.xlu2 %v838_v3  ;;  %671 = vset.pattern.permute.xlu0 %v838_v3  ;;  %vm338_vm1 = vcmask 1035264   ;;  %vm354_vm2 = vcmask 1044464   ;;  %vm344_vm3 = vcmask 1044472   ;;  %vm369_vm4 = vcmask 1043456   ;;  %s580_s7 = sshll.u32 %s818_s18, 1  ;;  %s398_s18 = scalar_lea.sflag [#allocation5], %s970_s27 }
  0x30   : > { %s324_s6 = scalar_select %p323_p3, %s822_s19, 1  ;;  %vm365_vm5 = vcmask 97280  }
  0x31   : > { %s409_s23 = sadd.s32 %s822_s19, %s580_s7 }
  0x32   : > { %s575_s14 = sshll.u32 %s324_s6, 2  ;;  %s581_s28 = sshll.u32 %s409_s23, 2 }
  0x33   : > { %s330_s13 = scalar_lea.vmem %s1043_s3, %s575_s14  ;;  %s326_s26 = scalar_lea.vmem %s1042_s2, %s575_s14 }
  0x34   : > { %v359_v2 = vld [vmem:[%s330_s13] sm:$0xf] }
  0x35   : > { %362 = vperm.xlu2 %670, %v359_v2   ;;  %v356_v10 = vld [vmem:[%s326_s26] sm:$0xf] }
  0x36   : > { %351 = vrot.lane.b32.xlu0 %v332_v1, %s836_s9  ;;  %341 = vrot.lane.b32.xlu1 %v332_v1, %s837_s11  ;;  %s411_s9 = scalar_lea.hbm %s1044_s4, %s581_s28  ;;  %s321_s11 = scalar_lea.vmem [#allocation8], %s973_s25 }
  0x37   : > { %s413_s6 = sshll.u32 %s321_s11, 4  ;;  %s415_s14 = sshll.u32 %s411_s9, 4  ;;  %s414_s6 = int_to_ptr.vmem [resolvable:$true] %s413_s6  ;;  %s416_s14 = int_to_ptr.hbm [resolvable:$true] %s415_s14 }
  0x38   : > { %s746_s19 = sshra.s32 %s416_s14, 4  ;;  %s752_s25 = scalar_lea.hbm %s1044_s4, 16  ;;  %s747_s19 = int_to_ptr.hbm [resolvable:$true] %s746_s19 }
  0x39   : > { %s748_s29 = scalar_lea.hbm %s747_s19, 4  ;;  %p753_p8 = scmp.lt.s32.totalorder %s747_s19, %s1044_s4 }
  0x3a   : > { %p749_p5 = scmp.ne.s32.totalorder %s747_s19, %s748_s29  ;;  %p754_p10 = scmp.lt.s32.totalorder %s752_s25, %s748_s29 }
  0x3c   : > { %p750_p6 = pnand %p749_p5, %p929_p9  ;;  %p755_p11 = por %p754_p10, %p753_p8 }
  0x3e   : > { %p751_p7 = pneg %p750_p6 }
  0x40   : > { %p756_p13 = pnand %p755_p11, %p751_p7 }
  0x8f   : > { %v363_v11 = vpop.permute.xlu2 %362 }
  0xa0   : > { %v347_v4 = vpop.permute.xlu0 %346  ;;  %v336_v5 = vpop.permute.xlu1 %335 }
  0xa1   : > { %350 = vst.msk [vmem:[#allocation2 + $0x8] sm:$0xf] %vm349_vm0, %v347_v4 }
  0xa2   : > { %339 = vst.msk [vmem:[#allocation2 + $0x4] sm:$0xf] %vm338_vm1, %v336_v5 }
  0xa8   : > { %v352_v6 = vpop.permute.xlu0 %351  ;;  %v342_v7 = vpop.permute.xlu1 %341 }
  0xa9   : > { %355 = vst.msk [vmem:[#allocation2 + $0x8] sm:$0xf] %vm354_vm2, %v352_v6 }
  0xaa   : > { %345 = vst.msk [vmem:[#allocation2 + $0x4] sm:$0xf] %vm344_vm3, %v342_v7 }
  0xb0   : > { %v358_v8 = vld [vmem:[#allocation2 + $0x8] sm:$0xf] }
  0xb1   : > { %577 = vmatpush.msk.msra.mxu0 %vm369_vm4, %v358_v8  ;;  %v357_v9 = vld [vmem:[#allocation2] sm:$0xff] }
  0xb3   : > { %388 = vmatpush.msra.mxu0 %v357_v9 }
  0xb4   : > { %578 = vmatmul.msk.f32.vlgmr.msra.gmra.mxu0 %vm365_vm5, %v356_v10 }
 0x131   : > { %v390_v12 = vpop.f32.mrf.mxu0 }
 0x132   : > { %v391_v13 = vadd.f32 %v390_v12, %v363_v11 }
 0x134   : > { %vm393_vm6 = vcmp.ge.f32.partialorder %v391_v13, 0.0  ;;  %v394_v14 = vmul.f32 0.1, %v391_v13 }
 0x136   : > { %v395_v15 = vsel %vm393_vm6, %v391_v13, %v394_v14 }
 0x137   : > { %396 = vst [vmem:[%s321_s11] sm:$0xf] %v395_v15 }
 0x138   : > { %759 = shalt.err (!%p756_p13)
}
 0x139   : > { %588 = dma.vmem_to_hbm [thread:$0]  (%p929_p9), %s414_s6, 64, %s416_s14, %s398_s18  }
 0x13a PF: > { %p602_p0 = scmp.ge.s32.totalorder %s834_s22, 2  ;;  %s427_s27 = sand.u32 1, %s806_s15  }
 0x13b   : > { %s428_s26 = scalar_lea.sflag [#allocation5], %s427_s27 }
 0x13c   : > { %p598_p1 = pnand %p602_p0, %p935_p12 }
 0x13e   : > { %p599_p2 = pneg %p598_p1 }
 0x140   : > { %801 = dma.done.wait (%p599_p2), %s428_s26, 64  }
 0x141   : > { %803 = vsyncadd (%p599_p2), %s428_s26, 4294967232  ;;  %s23_s22 = sadd.s32 1, %s834_s22   ;;  %s1058_s18 = sld [smem:[#allocation12_spill]] }
 0x142   : > { %p20_p4 = scmp.ge.s32.totalorder %s23_s22, 6   ;;  %s1059_s19 = sld [smem:[#allocation13_spill]] }
 0x143   : > { %s1060_s20 = sld [smem:[#allocation14_spill]]  ;;  %s1062_s15 = smov %s810_s16 }
 0x144   : > { %s1061_s21 = sld [smem:[#allocation15_spill]]  ;;  %s1063_s16 = smov %s814_s17 }
 0x145   : > { %s1064_s17 = smov %s944_s10  ;;  %22 = sbr.rel (!%p20_p4) target bundleno = 9 (0x9), region = 100 }
 0x14a   :  { %434 = vsyncpa [#allocation4], 1 }
 0x14b   :  { %436 = vsyncpa [#allocation4 + $0x1], 1 }
 0x14c   :  { %437 = vsyncpa [#allocation7], 1 }
 0x14d   :  { %439 = vsyncpa [#allocation7 + $0x1], 1 }
 0x14e   :  { %440 = vsyncpa [#allocation5], 1 }
 0x14f   :  { %442 = vsyncpa [#allocation5 + $0x1], 1 }

</bundles_post_ra>
